<compile_context>
chip_gen: v5e
topology: v5e:2x2
jax: 0.10.0
libtpu: 0.0.40
codegen_flags: <defaults>
</compile_context>

<pallas_src>
import math
import functools

import jax
import jax.numpy as jnp
from jax import lax
from jax.experimental import pallas as pl
from jax.experimental.pallas import tpu as pltpu

F32 = jnp.float32
BF16 = jnp.bfloat16

_PAR = pltpu.CompilerParams(dimension_semantics=("parallel",))


# ----------------------------------------------------------------------------
# BlockSpec helpers
# ----------------------------------------------------------------------------
def _const_spec(shape):
    """Whole array as one block, constant block index -> VMEM-resident weights."""
    zeros = (0,) * len(shape)
    return pl.BlockSpec(tuple(shape), lambda b: zeros)


def _batch_spec(tail):
    """(B, *tail) array, one sample per grid step along the batch axis."""
    zeros = (0,) * len(tail)
    return pl.BlockSpec((1,) + tuple(tail), lambda b: (b,) + zeros)


# ----------------------------------------------------------------------------
# Pallas kernels
# ----------------------------------------------------------------------------
def _step_kernel(tokens_ref, centers_ref, maskf_ref,
                 pos_w1_ref, pos_b1_ref, pos_w2_ref, pos_b2_ref,
                 qemb_ref, wq_ref, bq_ref, wkv_ref, bkv_ref,
                 wo_ref, bo_ref, ff1_w_ref, ff1_b_ref,
                 ff2_w_ref, ff2_b_ref, head_w_ref, head_b_ref,
                 out_ref):
    """Fused per-step transformer forward for one sample.

    pos-MLP -> (masked-position zeroing) -> QKV -> single-head cross-attention
    -> output proj + residual -> FFN + residual -> concatenated token|center
    head.  bf16 MXU operands, f32 accumulation, f32 element-wise math.
    TODO(synk): the full DETR-style multi-layer transformer / aux outputs of
    MaskGPCT are approximated with a single cross-attention block + FFN.
    """
    D = tokens_ref.shape[-1]

    def mm(x, w_ref):
        return jnp.dot(x.astype(BF16), w_ref[...],
                       preferred_element_type=jnp.float32)

    t = tokens_ref[0]          # (G, D)  f32
    c = centers_ref[0]         # (G, 3)  f32
    m = maskf_ref[0]           # (G, 1)  f32, 1.0 where masked

    # pos-embed MLP; zero at masked positions (same as the scatter in torch)
    pos_h = jax.nn.gelu(mm(c, pos_w1_ref) + pos_b1_ref[...], approximate=True)
    pos = (mm(pos_h, pos_w2_ref) + pos_b2_ref[...]) * (1.0 - m)
    mem = t + pos

    qe = qemb_ref[...]                                     # (G, D)
    q = mm(qe, wq_ref) + bq_ref[...]                       # (G, D)
    kv = mm(mem, wkv_ref) + bkv_ref[...]                   # (G, 2D)
    k = kv[:, :D]
    v = kv[:, D:]

    s = lax.dot_general(q.astype(BF16), k.astype(BF16),
                        (((1,), (1,)), ((), ())),
                        preferred_element_type=jnp.float32)
    s = s * (1.0 / math.sqrt(D))
    s = s - jnp.max(s, axis=-1, keepdims=True)
    p = jnp.exp(s)
    p = p * pl.reciprocal(jnp.sum(p, axis=-1, keepdims=True), approx=True)
    a = jnp.dot(p.astype(BF16), v.astype(BF16),
                preferred_element_type=jnp.float32)

    h = qe + mm(a, wo_ref) + bo_ref[...]
    ffh = jax.nn.gelu(mm(h, ff1_w_ref) + ff1_b_ref[...], approximate=True)
    h = h + mm(ffh, ff2_w_ref) + ff2_b_ref[...]

    # concatenated token-logits | center head -> one lane-denser output slab
    out_ref[0] = mm(h, head_w_ref) + head_b_ref[...]       # (G, V+3)


def _conf_kernel(logits_ref, ids_ref, unk_ref, gum_ref, conf_ref):
    """Fused softmax-select + confidence via log-sum-exp (no log(0) hazard)."""
    l = logits_ref[0]          # (G, V) f32
    ids = ids_ref[0]           # (G, 1) int32
    unk = unk_ref[0]           # (G, 1) int32 (1 == still unknown)
    g = gum_ref[0]             # (G, 1) f32, temperature-scaled gumbel noise

    mx = jnp.max(l, axis=-1, keepdims=True)
    lse = jnp.log(jnp.sum(jnp.exp(l - mx), axis=-1, keepdims=True)) + mx
    iota = lax.broadcasted_iota(jnp.int32, l.shape, 1)
    sel_logit = jnp.sum(jnp.where(iota == ids, l, 0.0), axis=-1, keepdims=True)
    logp = sel_logit - lse                                  # log selected prob

    big = jnp.float32(1e30)    # stands in for +inf for known tokens
    conf_ref[0] = jnp.where(unk > 0, logp, big) + g


def _decode_kernel(x_ref, dg_w_ref, dg_b_ref, cf_w_ref, cf_b_ref, out_ref):
    """Fused dGCNN-ish feature MLP + concatenated coarse|fine decoder head.
    TODO(synk): dvae.dgcnn_2 / dvae.decoder are approximated by this two-layer
    MLP on the synthetic weight set."""
    x = x_ref[0]               # (G, D+3)
    feat = jax.nn.gelu(
        jnp.dot(x.astype(BF16), dg_w_ref[...],
                preferred_element_type=jnp.float32) + dg_b_ref[...],
        approximate=True)
    out_ref[0] = (jnp.dot(feat.astype(BF16), cf_w_ref[...],
                          preferred_element_type=jnp.float32) + cf_b_ref[...])


# ----------------------------------------------------------------------------
# Pallas wrappers
# ----------------------------------------------------------------------------
def fused_step(params, tokens, centers, maskf):
    B, G, D = tokens.shape
    H = params["pos_w1"].shape[1]
    FF = params["ff1_w"].shape[1]
    V3 = params["head_w"].shape[1]                 # V + 3
    return pl.pallas_call(
        _step_kernel,
        out_shape=jax.ShapeDtypeStruct((B, G, V3), F32),
        grid=(B,),
        in_specs=[
            _batch_spec((G, D)),                   # tokens
            _batch_spec((G, 3)),                   # centers
            _batch_spec((G, 1)),                   # mask (1.0 where masked)
            _const_spec((3, H)), _const_spec((1, H)),      # pos MLP
            _const_spec((H, D)), _const_spec((1, D)),
            _const_spec((G, D)),                           # query_embed
            _const_spec((D, D)), _const_spec((1, D)),      # wq, bq
            _const_spec((D, 2 * D)), _const_spec((1, 2 * D)),  # wk|wv
            _const_spec((D, D)), _const_spec((1, D)),      # wo, bo
            _const_spec((D, FF)), _const_spec((1, FF)),    # ffn
            _const_spec((FF, D)), _const_spec((1, D)),
            _const_spec((D, V3)), _const_spec((1, V3)),    # tok|ctr head
        ],
        out_specs=_batch_spec((G, V3)),
        compiler_params=_PAR,
    )(tokens, centers, maskf,
      params["pos_w1"], params["pos_b1"], params["pos_w2"], params["pos_b2"],
      params["query_embed"], params["wq"], params["bq"],
      params["wkv"], params["bkv"], params["wo"], params["bo"],
      params["ff1_w"], params["ff1_b"], params["ff2_w"], params["ff2_b"],
      params["head_w"], params["head_b"])


def fused_confidence(logits, mixed_ids, unknown, gum_scaled):
    B, G, V = logits.shape
    conf = pl.pallas_call(
        _conf_kernel,
        out_shape=jax.ShapeDtypeStruct((B, G, 1), F32),
        grid=(B,),
        in_specs=[_batch_spec((G, V)), _batch_spec((G, 1)),
                  _batch_spec((G, 1)), _batch_spec((G, 1))],
        out_specs=_batch_spec((G, 1)),
        compiler_params=_PAR,
    )(logits,
      mixed_ids.astype(jnp.int32)[..., None],
      unknown.astype(jnp.int32)[..., None],
      gum_scaled[..., None])
    return conf[..., 0]


def fused_decode(params, cfg, pred_tokens, centers):
    B, G, D = pred_tokens.shape
    S, C = cfg["group_size"], cfg["coarse_num"]
    N = (C + S) * 3
    x = jnp.concatenate([pred_tokens, centers], axis=-1)   # (B, G, D+3)
    slab = pl.pallas_call(
        _decode_kernel,
        out_shape=jax.ShapeDtypeStruct((B, G, N), F32),
        grid=(B,),
        in_specs=[_batch_spec((G, D + 3)),
                  _const_spec((D + 3, D)), _const_spec((1, D)),
                  _const_spec((D, N)), _const_spec((1, N))],
        out_specs=_batch_spec((G, N)),
        compiler_params=_PAR,
    )(x, params["dg_w"], params["dg_b"], params["cf_w"], params["cf_b"])
    coarse = slab[..., :C * 3].reshape(B, G, C, 3)
    fine = slab[..., C * 3:].reshape(B, G, S, 3)
    whole_coarse = (coarse + centers[:, :, None, :]).reshape(B, -1, 3)
    whole_fine = (fine + centers[:, :, None, :]).reshape(B, -1, 3)
    return whole_coarse, whole_fine, coarse, fine


# ----------------------------------------------------------------------------
# Synthetic MaskGPCT / dVAE parameters (deterministic init, kernel dtypes)
# ----------------------------------------------------------------------------
def init_params(key, cfg):
    D, G, V = cfg["trans_dim"], cfg["num_queries"], cfg["num_tokens"]
    H, S, C = cfg["pos_hidden"], cfg["group_size"], cfg["coarse_num"]
    FF = 4 * D
    ks = jax.random.split(key, 20)

    def w(k, shape, scale=0.1, dtype=BF16):
        return (scale * jax.random.normal(k, shape, dtype=F32)).astype(dtype)

    def b(n):
        return jnp.zeros((1, n), F32)

    wk = w(ks[6], (D, D))
    wv = w(ks[7], (D, D))
    tok_w = w(ks[11], (D, V))
    ctr_w = w(ks[12], (D, 3))
    coarse_w = w(ks[14], (D, C * 3))
    fine_w = w(ks[15], (D, S * 3))

    return {
        "mask_token": w(ks[0], (1, 1, D), dtype=F32),
        "query_embed": w(ks[1], (G, D), dtype=F32),
        "codebook": w(ks[2], (V, D), dtype=F32),
        "pos_w1": w(ks[3], (3, H)), "pos_b1": b(H),
        "pos_w2": w(ks[4], (H, D)), "pos_b2": b(D),
        "wq": w(ks[5], (D, D)), "bq": b(D),
        "wkv": jnp.concatenate([wk, wv], axis=1), "bkv": b(2 * D),
        "wo": w(ks[8], (D, D)), "bo": b(D),
        "ff1_w": w(ks[9], (D, FF)), "ff1_b": b(FF),
        "ff2_w": w(ks[10], (FF, D)), "ff2_b": b(D),
        "head_w": jnp.concatenate([tok_w, ctr_w], axis=1), "head_b": b(V + 3),
        "dg_w": w(ks[13], (D + 3, D)), "dg_b": b(D),
        "cf_w": jnp.concatenate([coarse_w, fine_w], axis=1),
        "cf_b": b((C + S) * 3),
    }


# ----------------------------------------------------------------------------
# Generator forward pass (mirrors the PyTorch control flow)
# ----------------------------------------------------------------------------
def sample_with_scheduler(params, cfg, key, T, num_clouds):
    G, D, V = cfg["num_queries"], cfg["trans_dim"], cfg["num_tokens"]
    mask_token_id = cfg["mask_token_id"]
    B = num_clouds

    # create_input_mask (unconditional path): everything masked
    bool_mask0 = jnp.ones((B, G), dtype=bool)
    mask_token_bc = jnp.broadcast_to(params["mask_token"], (B, G, D)).astype(F32)
    cur_tokens0 = mask_token_bc
    cur_token_ids0 = jnp.full((B, G), mask_token_id, dtype=jnp.int32)
    mask_centers = jnp.full((B, G, 3), float(mask_token_id), dtype=F32)
    cur_centers0 = mask_centers
    unknown_begin = jnp.sum(bool_mask0, axis=-1).astype(F32)          # (B,)

    # pre-sample all gumbel noise for the T steps
    k1, k2 = jax.random.split(key)
    gum_logits = jax.random.gumbel(k1, (T, B, G, V), dtype=F32)
    gum_conf = jax.random.gumbel(k2, (T, B, G), dtype=F32)

    def step(t, carry):
        bool_mask, cur_tokens, cur_token_ids, cur_centers = carry

        maskf = bool_mask.astype(F32)[..., None]                      # (B,G,1)
        slab = fused_step(params, cur_tokens, cur_centers, maskf)     # (B,G,V+3)
        logits = slab[..., :V]
        out_centers = slab[..., V:]

        # categorical sampling via gumbel-max + codebook gather (jitted glue)
        sampled_ids = jnp.argmax(logits + gum_logits[t], axis=-1).astype(jnp.int32)
        sampled_tokens = params["codebook"][sampled_ids]              # (B,G,D)

        unknown_map = cur_token_ids == mask_token_id                  # (B,G)
        mixed_ids = jnp.where(unknown_map, sampled_ids, cur_token_ids)
        um3 = unknown_map[..., None]
        mixed_tokens = jnp.where(um3, sampled_tokens, cur_tokens)
        mixed_centers = jnp.where(um3, out_centers, cur_centers)

        ratio = (t.astype(F32) + 1.0) / T
        mask_ratio = jnp.cos(ratio * jnp.pi / 2)                      # gamma
        temp = cfg["choice_temperature"] * (1.0 - ratio)

        conf = fused_confidence(logits, mixed_ids, unknown_map,
                                temp * gum_conf[t])                   # (B,G)

        mask_len = jnp.floor(unknown_begin[:, None] * mask_ratio)     # (B,1)
        mask_len = jnp.maximum(
            0.0,
            jnp.minimum(
                jnp.sum(unknown_map, axis=-1, keepdims=True).astype(F32) - 1.0,
                mask_len))
        # mask_by_random_topk: sort + take_along_dim (no clean Pallas sort)
        sorted_conf = jnp.sort(conf, axis=-1)
        cutoff = jnp.take_along_axis(sorted_conf, mask_len.astype(jnp.int32),
                                     axis=-1)
        new_mask = conf < cutoff                                      # (B,G)

        new_token_ids = jnp.where(new_mask, mask_token_id,
                                  mixed_ids).astype(jnp.int32)
        nm3 = new_mask[..., None]
        new_centers = jnp.where(nm3, mask_centers, mixed_centers)
        new_tokens = jnp.where(nm3, mask_token_bc, mixed_tokens)
        return (new_mask, new_tokens, new_token_ids, new_centers)

    carry = lax.fori_loop(
        0, T, step, (bool_mask0, cur_tokens0, cur_token_ids0, cur_centers0))
    _, cur_tokens, cur_token_ids, cur_centers = carry
    return cur_tokens, cur_token_ids, cur_centers


def log_cloud(params, cfg, key, T=8, num_clouds=1):
    # TODO(synk): dvae.group_divider / dvae.encoder / dgcnn_1 (conditional path)
    # are skipped because forward() runs the unconditional path (pc=None).
    pred_tokens, _, centers = sample_with_scheduler(params, cfg, key, T, num_clouds)
    whole_coarse, whole_fine, coarse, fine = fused_decode(
        params, cfg, pred_tokens, centers)
    assert fine.shape[2] == cfg["group_size"]
    return (whole_coarse, whole_fine, coarse, fine, None, None, centers)


def make_generator(cfg, T=8, num_clouds=1):
    @jax.jit
    def fwd(params, key):
        return log_cloud(params, cfg, key, T=T, num_clouds=num_clouds)
    return fwd


# ----------------------------------------------------------------------------
if __name__ == "__main__":
    cfg = dict(
        num_queries=8,        # dvae_config.num_group
        trans_dim=32,         # transformer_config.trans_dim
        num_tokens=16,        # dvae_config.num_tokens
        mask_token_id=17,     # num_tokens + 1
        group_size=4,         # dvae_config.group_size
        coarse_num=4,
        pos_hidden=32,
        choice_temperature=4.5,
    )
    key = jax.random.PRNGKey(0)
    pkey, skey = jax.random.split(key)
    params = init_params(pkey, cfg)

    generator_forward = make_generator(cfg, T=8, num_clouds=1)
    ret = generator_forward(params, skey)
    whole_coarse, whole_fine, coarse, fine, _, _, centers = ret
    jax.block_until_ready((whole_coarse, whole_fine, coarse, fine, centers))
    print("KERNEL_OK")
</pallas_src>

<mosaic_0001>
module attributes {stable_mosaic.version = 11 : i64} {
  func.func @_step_kernel(%arg0: i32, %arg1: memref<1x8x32xf32, #tpu.memory_space<vmem>>, %arg2: memref<1x8x3xf32, #tpu.memory_space<vmem>>, %arg3: memref<1x8x1xf32, #tpu.memory_space<vmem>>, %arg4: memref<3x32xbf16, #tpu.memory_space<vmem>>, %arg5: memref<1x32xf32, #tpu.memory_space<vmem>>, %arg6: memref<32x32xbf16, #tpu.memory_space<vmem>>, %arg7: memref<1x32xf32, #tpu.memory_space<vmem>>, %arg8: memref<8x32xf32, #tpu.memory_space<vmem>>, %arg9: memref<32x32xbf16, #tpu.memory_space<vmem>>, %arg10: memref<1x32xf32, #tpu.memory_space<vmem>>, %arg11: memref<32x64xbf16, #tpu.memory_space<vmem>>, %arg12: memref<1x64xf32, #tpu.memory_space<vmem>>, %arg13: memref<32x32xbf16, #tpu.memory_space<vmem>>, %arg14: memref<1x32xf32, #tpu.memory_space<vmem>>, %arg15: memref<32x128xbf16, #tpu.memory_space<vmem>>, %arg16: memref<1x128xf32, #tpu.memory_space<vmem>>, %arg17: memref<128x32xbf16, #tpu.memory_space<vmem>>, %arg18: memref<1x32xf32, #tpu.memory_space<vmem>>, %arg19: memref<32x19xbf16, #tpu.memory_space<vmem>>, %arg20: memref<1x19xf32, #tpu.memory_space<vmem>>, %arg21: memref<1x8x19xf32, #tpu.memory_space<vmem>>) attributes {dimension_semantics = [#tpu.dimension_semantics<parallel>], iteration_bounds = array<i64: 1>, scalar_prefetch = 0 : i64, scratch_operands = 0 : i64, tpu.core_type = #tpu.core_type<tc>, window_params = [{transform_indices = @transform_0, window_bounds = array<i64: 1, 8, 32>}, {transform_indices = @transform_1, window_bounds = array<i64: 1, 8, 3>}, {transform_indices = @transform_2, window_bounds = array<i64: 1, 8, 1>}, {pipeline_mode = #tpu.pipeline_mode<synchronous>, transform_indices = @transform_3, window_bounds = array<i64: 3, 32>}, {pipeline_mode = #tpu.pipeline_mode<synchronous>, transform_indices = @transform_4, window_bounds = array<i64: 1, 32>}, {pipeline_mode = #tpu.pipeline_mode<synchronous>, transform_indices = @transform_5, window_bounds = array<i64: 32, 32>}, {pipeline_mode = #tpu.pipeline_mode<synchronous>, transform_indices = @transform_6, window_bounds = array<i64: 1, 32>}, {pipeline_mode = #tpu.pipeline_mode<synchronous>, transform_indices = @transform_7, window_bounds = array<i64: 8, 32>}, {pipeline_mode = #tpu.pipeline_mode<synchronous>, transform_indices = @transform_8, window_bounds = array<i64: 32, 32>}, {pipeline_mode = #tpu.pipeline_mode<synchronous>, transform_indices = @transform_9, window_bounds = array<i64: 1, 32>}, {pipeline_mode = #tpu.pipeline_mode<synchronous>, transform_indices = @transform_10, window_bounds = array<i64: 32, 64>}, {pipeline_mode = #tpu.pipeline_mode<synchronous>, transform_indices = @transform_11, window_bounds = array<i64: 1, 64>}, {pipeline_mode = #tpu.pipeline_mode<synchronous>, transform_indices = @transform_12, window_bounds = array<i64: 32, 32>}, {pipeline_mode = #tpu.pipeline_mode<synchronous>, transform_indices = @transform_13, window_bounds = array<i64: 1, 32>}, {pipeline_mode = #tpu.pipeline_mode<synchronous>, transform_indices = @transform_14, window_bounds = array<i64: 32, 128>}, {pipeline_mode = #tpu.pipeline_mode<synchronous>, transform_indices = @transform_15, window_bounds = array<i64: 1, 128>}, {pipeline_mode = #tpu.pipeline_mode<synchronous>, transform_indices = @transform_16, window_bounds = array<i64: 128, 32>}, {pipeline_mode = #tpu.pipeline_mode<synchronous>, transform_indices = @transform_17, window_bounds = array<i64: 1, 32>}, {pipeline_mode = #tpu.pipeline_mode<synchronous>, transform_indices = @transform_18, window_bounds = array<i64: 32, 19>}, {pipeline_mode = #tpu.pipeline_mode<synchronous>, transform_indices = @transform_19, window_bounds = array<i64: 1, 19>}, {transform_indices = @transform_20, window_bounds = array<i64: 1, 8, 19>}]} {
    %c0 = arith.constant 0 : index
    %c0_0 = arith.constant 0 : index
    %c0_1 = arith.constant 0 : index
    %0 = vector.load %arg1[%c0, %c0_0, %c0_1] : memref<1x8x32xf32, #tpu.memory_space<vmem>>, vector<1x8x32xf32>
    %1 = vector.shape_cast %0 : vector<1x8x32xf32> to vector<8x32xf32>
    %c0_2 = arith.constant 0 : index
    %c0_3 = arith.constant 0 : index
    %c0_4 = arith.constant 0 : index
    %2 = vector.load %arg2[%c0_2, %c0_3, %c0_4] : memref<1x8x3xf32, #tpu.memory_space<vmem>>, vector<1x8x3xf32>
    %3 = vector.shape_cast %2 : vector<1x8x3xf32> to vector<8x3xf32>
    %c0_5 = arith.constant 0 : index
    %c0_6 = arith.constant 0 : index
    %c0_7 = arith.constant 0 : index
    %4 = vector.load %arg3[%c0_5, %c0_6, %c0_7] : memref<1x8x1xf32, #tpu.memory_space<vmem>>, vector<1x8x1xf32>
    %5 = vector.shape_cast %4 : vector<1x8x1xf32> to vector<8x1xf32>
    %6 = arith.truncf %3 : vector<8x3xf32> to vector<8x3xbf16>
    %c0_8 = arith.constant 0 : index
    %c0_9 = arith.constant 0 : index
    %7 = vector.load %arg4[%c0_8, %c0_9] : memref<3x32xbf16, #tpu.memory_space<vmem>>, vector<3x32xbf16>
    %cst = arith.constant dense<0.000000e+00> : vector<8x32xf32>
    %8 = tpu.matmul %6, %7, %cst {dimension_numbers = #tpu.dot_dimension_numbers<[1], [0], [0], [1], [0, 0, 1, 1], [], []>} : vector<8x3xbf16>, vector<3x32xbf16>, vector<8x32xf32> -> vector<8x32xf32>
    %c0_10 = arith.constant 0 : index
    %c0_11 = arith.constant 0 : index
    %9 = vector.load %arg5[%c0_10, %c0_11] : memref<1x32xf32, #tpu.memory_space<vmem>>, vector<1x32xf32>
    %10 = vector.broadcast %9 : vector<1x32xf32> to vector<8x32xf32>
    %11 = arith.addf %8, %10 : vector<8x32xf32>
    %12 = arith.mulf %11, %11 : vector<8x32xf32>
    %13 = arith.mulf %11, %12 : vector<8x32xf32>
    %cst_12 = arith.constant 4.471500e-02 : f32
    %14 = vector.broadcast %cst_12 : f32 to vector<8x32xf32>
    %15 = arith.mulf %14, %13 : vector<8x32xf32>
    %16 = arith.addf %11, %15 : vector<8x32xf32>
    %cst_13 = arith.constant 0.797884583 : f32
    %17 = vector.broadcast %cst_13 : f32 to vector<8x32xf32>
    %18 = arith.mulf %17, %16 : vector<8x32xf32>
    %19 = math.tanh %18 : vector<8x32xf32>
    %cst_14 = arith.constant 1.000000e+00 : f32
    %20 = vector.broadcast %cst_14 : f32 to vector<8x32xf32>
    %21 = arith.addf %20, %19 : vector<8x32xf32>
    %cst_15 = arith.constant 5.000000e-01 : f32
    %22 = vector.broadcast %cst_15 : f32 to vector<8x32xf32>
    %23 = arith.mulf %22, %21 : vector<8x32xf32>
    %24 = arith.mulf %11, %23 : vector<8x32xf32>
    %25 = arith.truncf %24 : vector<8x32xf32> to vector<8x32xbf16>
    %c0_16 = arith.constant 0 : index
    %c0_17 = arith.constant 0 : index
    %26 = vector.load %arg6[%c0_16, %c0_17] : memref<32x32xbf16, #tpu.memory_space<vmem>>, vector<32x32xbf16>
    %cst_18 = arith.constant dense<0.000000e+00> : vector<8x32xf32>
    %27 = tpu.matmul %25, %26, %cst_18 {dimension_numbers = #tpu.dot_dimension_numbers<[1], [0], [0], [1], [0, 0, 1, 1], [], []>} : vector<8x32xbf16>, vector<32x32xbf16>, vector<8x32xf32> -> vector<8x32xf32>
    %c0_19 = arith.constant 0 : index
    %c0_20 = arith.constant 0 : index
    %28 = vector.load %arg7[%c0_19, %c0_20] : memref<1x32xf32, #tpu.memory_space<vmem>>, vector<1x32xf32>
    %29 = vector.broadcast %28 : vector<1x32xf32> to vector<8x32xf32>
    %30 = arith.addf %27, %29 : vector<8x32xf32>
    %cst_21 = arith.constant 1.000000e+00 : f32
    %31 = vector.broadcast %cst_21 : f32 to vector<8x1xf32>
    %32 = arith.subf %31, %5 : vector<8x1xf32>
    %33 = vector.broadcast %32 : vector<8x1xf32> to vector<8x32xf32>
    %34 = arith.mulf %30, %33 : vector<8x32xf32>
    %35 = arith.addf %1, %34 : vector<8x32xf32>
    %c0_22 = arith.constant 0 : index
    %c0_23 = arith.constant 0 : index
    %36 = vector.load %arg8[%c0_22, %c0_23] : memref<8x32xf32, #tpu.memory_space<vmem>>, vector<8x32xf32>
    %37 = arith.truncf %36 : vector<8x32xf32> to vector<8x32xbf16>
    %c0_24 = arith.constant 0 : index
    %c0_25 = arith.constant 0 : index
    %38 = vector.load %arg9[%c0_24, %c0_25] : memref<32x32xbf16, #tpu.memory_space<vmem>>, vector<32x32xbf16>
    %cst_26 = arith.constant dense<0.000000e+00> : vector<8x32xf32>
    %39 = tpu.matmul %37, %38, %cst_26 {dimension_numbers = #tpu.dot_dimension_numbers<[1], [0], [0], [1], [0, 0, 1, 1], [], []>} : vector<8x32xbf16>, vector<32x32xbf16>, vector<8x32xf32> -> vector<8x32xf32>
    %c0_27 = arith.constant 0 : index
    %c0_28 = arith.constant 0 : index
    %40 = vector.load %arg10[%c0_27, %c0_28] : memref<1x32xf32, #tpu.memory_space<vmem>>, vector<1x32xf32>
    %41 = vector.broadcast %40 : vector<1x32xf32> to vector<8x32xf32>
    %42 = arith.addf %39, %41 : vector<8x32xf32>
    %43 = arith.truncf %35 : vector<8x32xf32> to vector<8x32xbf16>
    %c0_29 = arith.constant 0 : index
    %c0_30 = arith.constant 0 : index
    %44 = vector.load %arg11[%c0_29, %c0_30] : memref<32x64xbf16, #tpu.memory_space<vmem>>, vector<32x64xbf16>
    %cst_31 = arith.constant dense<0.000000e+00> : vector<8x64xf32>
    %45 = tpu.matmul %43, %44, %cst_31 {dimension_numbers = #tpu.dot_dimension_numbers<[1], [0], [0], [1], [0, 0, 1, 1], [], []>} : vector<8x32xbf16>, vector<32x64xbf16>, vector<8x64xf32> -> vector<8x64xf32>
    %c0_32 = arith.constant 0 : index
    %c0_33 = arith.constant 0 : index
    %46 = vector.load %arg12[%c0_32, %c0_33] : memref<1x64xf32, #tpu.memory_space<vmem>>, vector<1x64xf32>
    %47 = vector.broadcast %46 : vector<1x64xf32> to vector<8x64xf32>
    %48 = arith.addf %45, %47 : vector<8x64xf32>
    %49 = vector.extract_strided_slice %48 {offsets = [0, 0], sizes = [8, 32], strides = [1, 1]} : vector<8x64xf32> to vector<8x32xf32>
    %50 = vector.extract_strided_slice %48 {offsets = [0, 32], sizes = [8, 32], strides = [1, 1]} : vector<8x64xf32> to vector<8x32xf32>
    %51 = arith.truncf %42 : vector<8x32xf32> to vector<8x32xbf16>
    %52 = arith.truncf %49 : vector<8x32xf32> to vector<8x32xbf16>
    %cst_34 = arith.constant dense<0.000000e+00> : vector<8x8xf32>
    %53 = tpu.matmul %51, %52, %cst_34 {dimension_numbers = #tpu.dot_dimension_numbers<[1], [1], [0], [0], [0, 0, 1, 0], [], []>} : vector<8x32xbf16>, vector<8x32xbf16>, vector<8x8xf32> -> vector<8x8xf32>
    %cst_35 = arith.constant 0.176776692 : f32
    %54 = vector.broadcast %cst_35 : f32 to vector<8x8xf32>
    %55 = arith.mulf %53, %54 : vector<8x8xf32>
    %cst_36 = arith.constant dense<0xFF800000> : vector<8xf32>
    %56 = vector.multi_reduction <maximumf>, %55, %cst_36 [1] : vector<8x8xf32> to vector<8xf32>
    %57 = vector.shape_cast %56 : vector<8xf32> to vector<8x1xf32>
    %58 = vector.broadcast %57 : vector<8x1xf32> to vector<8x8xf32>
    %59 = arith.subf %55, %58 : vector<8x8xf32>
    %60 = math.exp %59 : vector<8x8xf32>
    %cst_37 = arith.constant dense<0.000000e+00> : vector<8xf32>
    %61 = vector.multi_reduction <add>, %60, %cst_37 [1] : vector<8x8xf32> to vector<8xf32>
    %62 = vector.shape_cast %61 : vector<8xf32> to vector<8x1xf32>
    %63 = tpu.reciprocal %62 {approx = true} : vector<8x1xf32> -> vector<8x1xf32>
    %64 = vector.broadcast %63 : vector<8x1xf32> to vector<8x8xf32>
    %65 = arith.mulf %60, %64 : vector<8x8xf32>
    %66 = arith.truncf %65 : vector<8x8xf32> to vector<8x8xbf16>
    %67 = arith.truncf %50 : vector<8x32xf32> to vector<8x32xbf16>
    %cst_38 = arith.constant dense<0.000000e+00> : vector<8x32xf32>
    %68 = tpu.matmul %66, %67, %cst_38 {dimension_numbers = #tpu.dot_dimension_numbers<[1], [0], [0], [1], [0, 0, 1, 1], [], []>} : vector<8x8xbf16>, vector<8x32xbf16>, vector<8x32xf32> -> vector<8x32xf32>
    %69 = arith.truncf %68 : vector<8x32xf32> to vector<8x32xbf16>
    %c0_39 = arith.constant 0 : index
    %c0_40 = arith.constant 0 : index
    %70 = vector.load %arg13[%c0_39, %c0_40] : memref<32x32xbf16, #tpu.memory_space<vmem>>, vector<32x32xbf16>
    %cst_41 = arith.constant dense<0.000000e+00> : vector<8x32xf32>
    %71 = tpu.matmul %69, %70, %cst_41 {dimension_numbers = #tpu.dot_dimension_numbers<[1], [0], [0], [1], [0, 0, 1, 1], [], []>} : vector<8x32xbf16>, vector<32x32xbf16>, vector<8x32xf32> -> vector<8x32xf32>
    %72 = arith.addf %36, %71 : vector<8x32xf32>
    %c0_42 = arith.constant 0 : index
    %c0_43 = arith.constant 0 : index
    %73 = vector.load %arg14[%c0_42, %c0_43] : memref<1x32xf32, #tpu.memory_space<vmem>>, vector<1x32xf32>
    %74 = vector.broadcast %73 : vector<1x32xf32> to vector<8x32xf32>
    %75 = arith.addf %72, %74 : vector<8x32xf32>
    %76 = arith.truncf %75 : vector<8x32xf32> to vector<8x32xbf16>
    %c0_44 = arith.constant 0 : index
    %c0_45 = arith.constant 0 : index
    %77 = vector.load %arg15[%c0_44, %c0_45] : memref<32x128xbf16, #tpu.memory_space<vmem>>, vector<32x128xbf16>
    %cst_46 = arith.constant dense<0.000000e+00> : vector<8x128xf32>
    %78 = tpu.matmul %76, %77, %cst_46 {dimension_numbers = #tpu.dot_dimension_numbers<[1], [0], [0], [1], [0, 0, 1, 1], [], []>} : vector<8x32xbf16>, vector<32x128xbf16>, vector<8x128xf32> -> vector<8x128xf32>
    %c0_47 = arith.constant 0 : index
    %c0_48 = arith.constant 0 : index
    %79 = vector.load %arg16[%c0_47, %c0_48] : memref<1x128xf32, #tpu.memory_space<vmem>>, vector<1x128xf32>
    %80 = vector.broadcast %79 : vector<1x128xf32> to vector<8x128xf32>
    %81 = arith.addf %78, %80 : vector<8x128xf32>
    %82 = arith.mulf %81, %81 : vector<8x128xf32>
    %83 = arith.mulf %81, %82 : vector<8x128xf32>
    %cst_49 = arith.constant 4.471500e-02 : f32
    %84 = vector.broadcast %cst_49 : f32 to vector<8x128xf32>
    %85 = arith.mulf %84, %83 : vector<8x128xf32>
    %86 = arith.addf %81, %85 : vector<8x128xf32>
    %cst_50 = arith.constant 0.797884583 : f32
    %87 = vector.broadcast %cst_50 : f32 to vector<8x128xf32>
    %88 = arith.mulf %87, %86 : vector<8x128xf32>
    %89 = math.tanh %88 : vector<8x128xf32>
    %cst_51 = arith.constant 1.000000e+00 : f32
    %90 = vector.broadcast %cst_51 : f32 to vector<8x128xf32>
    %91 = arith.addf %90, %89 : vector<8x128xf32>
    %cst_52 = arith.constant 5.000000e-01 : f32
    %92 = vector.broadcast %cst_52 : f32 to vector<8x128xf32>
    %93 = arith.mulf %92, %91 : vector<8x128xf32>
    %94 = arith.mulf %81, %93 : vector<8x128xf32>
    %95 = arith.truncf %94 : vector<8x128xf32> to vector<8x128xbf16>
    %c0_53 = arith.constant 0 : index
    %c0_54 = arith.constant 0 : index
    %96 = vector.load %arg17[%c0_53, %c0_54] : memref<128x32xbf16, #tpu.memory_space<vmem>>, vector<128x32xbf16>
    %cst_55 = arith.constant dense<0.000000e+00> : vector<8x32xf32>
    %97 = tpu.matmul %95, %96, %cst_55 {dimension_numbers = #tpu.dot_dimension_numbers<[1], [0], [0], [1], [0, 0, 1, 1], [], []>} : vector<8x128xbf16>, vector<128x32xbf16>, vector<8x32xf32> -> vector<8x32xf32>
    %98 = arith.addf %75, %97 : vector<8x32xf32>
    %c0_56 = arith.constant 0 : index
    %c0_57 = arith.constant 0 : index
    %99 = vector.load %arg18[%c0_56, %c0_57] : memref<1x32xf32, #tpu.memory_space<vmem>>, vector<1x32xf32>
    %100 = vector.broadcast %99 : vector<1x32xf32> to vector<8x32xf32>
    %101 = arith.addf %98, %100 : vector<8x32xf32>
    %102 = arith.truncf %101 : vector<8x32xf32> to vector<8x32xbf16>
    %c0_58 = arith.constant 0 : index
    %c0_59 = arith.constant 0 : index
    %103 = vector.load %arg19[%c0_58, %c0_59] : memref<32x19xbf16, #tpu.memory_space<vmem>>, vector<32x19xbf16>
    %cst_60 = arith.constant dense<0.000000e+00> : vector<8x19xf32>
    %104 = tpu.matmul %102, %103, %cst_60 {dimension_numbers = #tpu.dot_dimension_numbers<[1], [0], [0], [1], [0, 0, 1, 1], [], []>} : vector<8x32xbf16>, vector<32x19xbf16>, vector<8x19xf32> -> vector<8x19xf32>
    %c0_61 = arith.constant 0 : index
    %c0_62 = arith.constant 0 : index
    %105 = vector.load %arg20[%c0_61, %c0_62] : memref<1x19xf32, #tpu.memory_space<vmem>>, vector<1x19xf32>
    %106 = vector.broadcast %105 : vector<1x19xf32> to vector<8x19xf32>
    %107 = arith.addf %104, %106 : vector<8x19xf32>
    %c0_63 = arith.constant 0 : index
    %c0_64 = arith.constant 0 : index
    %c0_65 = arith.constant 0 : index
    %108 = vector.load %arg21[%c0_63, %c0_64, %c0_65] : memref<1x8x19xf32, #tpu.memory_space<vmem>>, vector<1x8x19xf32>
    %109 = vector.shape_cast %108 : vector<1x8x19xf32> to vector<8x19xf32>
    %110 = vector.shape_cast %107 : vector<8x19xf32> to vector<1x8x19xf32>
    tpu.vector_store %arg21[%c0_63, %c0_64, %c0_65], %110 {strides = array<i32>} : memref<1x8x19xf32, #tpu.memory_space<vmem>>, vector<1x8x19xf32>,
    return
  }
  func.func @transform_0(%arg0: i32) -> (i32, i32, i32) {
    %c0_i32 = arith.constant 0 : i32
    %c0_i32_0 = arith.constant 0 : i32
    %c0_i32_1 = arith.constant 0 : i32
    return %arg0, %c0_i32, %c0_i32_0 : i32, i32, i32
  }
  func.func @transform_1(%arg0: i32) -> (i32, i32, i32) {
    %c0_i32 = arith.constant 0 : i32
    %c0_i32_0 = arith.constant 0 : i32
    %c0_i32_1 = arith.constant 0 : i32
    return %arg0, %c0_i32, %c0_i32_0 : i32, i32, i32
  }
  func.func @transform_2(%arg0: i32) -> (i32, i32, i32) {
    %c0_i32 = arith.constant 0 : i32
    %c0_i32_0 = arith.constant 0 : i32
    %c0_i32_1 = arith.constant 0 : i32
    return %arg0, %c0_i32, %c0_i32_0 : i32, i32, i32
  }
  func.func @transform_3(%arg0: i32) -> (i32, i32) {
    %c0_i32 = arith.constant 0 : i32
    %c0_i32_0 = arith.constant 0 : i32
    %c0_i32_1 = arith.constant 0 : i32
    return %c0_i32, %c0_i32_0 : i32, i32
  }
  func.func @transform_4(%arg0: i32) -> (i32, i32) {
    %c0_i32 = arith.constant 0 : i32
    %c0_i32_0 = arith.constant 0 : i32
    %c0_i32_1 = arith.constant 0 : i32
    return %c0_i32, %c0_i32_0 : i32, i32
  }
  func.func @transform_5(%arg0: i32) -> (i32, i32) {
    %c0_i32 = arith.constant 0 : i32
    %c0_i32_0 = arith.constant 0 : i32
    %c0_i32_1 = arith.constant 0 : i32
    return %c0_i32, %c0_i32_0 : i32, i32
  }
  func.func @transform_6(%arg0: i32) -> (i32, i32) {
    %c0_i32 = arith.constant 0 : i32
    %c0_i32_0 = arith.constant 0 : i32
    %c0_i32_1 = arith.constant 0 : i32
    return %c0_i32, %c0_i32_0 : i32, i32
  }
  func.func @transform_7(%arg0: i32) -> (i32, i32) {
    %c0_i32 = arith.constant 0 : i32
    %c0_i32_0 = arith.constant 0 : i32
    %c0_i32_1 = arith.constant 0 : i32
    return %c0_i32, %c0_i32_0 : i32, i32
  }
  func.func @transform_8(%arg0: i32) -> (i32, i32) {
    %c0_i32 = arith.constant 0 : i32
    %c0_i32_0 = arith.constant 0 : i32
    %c0_i32_1 = arith.constant 0 : i32
    return %c0_i32, %c0_i32_0 : i32, i32
  }
  func.func @transform_9(%arg0: i32) -> (i32, i32) {
    %c0_i32 = arith.constant 0 : i32
    %c0_i32_0 = arith.constant 0 : i32
    %c0_i32_1 = arith.constant 0 : i32
    return %c0_i32, %c0_i32_0 : i32, i32
  }
  func.func @transform_10(%arg0: i32) -> (i32, i32) {
    %c0_i32 = arith.constant 0 : i32
    %c0_i32_0 = arith.constant 0 : i32
    %c0_i32_1 = arith.constant 0 : i32
    return %c0_i32, %c0_i32_0 : i32, i32
  }
  func.func @transform_11(%arg0: i32) -> (i32, i32) {
    %c0_i32 = arith.constant 0 : i32
    %c0_i32_0 = arith.constant 0 : i32
    %c0_i32_1 = arith.constant 0 : i32
    return %c0_i32, %c0_i32_0 : i32, i32
  }
  func.func @transform_12(%arg0: i32) -> (i32, i32) {
    %c0_i32 = arith.constant 0 : i32
    %c0_i32_0 = arith.constant 0 : i32
    %c0_i32_1 = arith.constant 0 : i32
    return %c0_i32, %c0_i32_0 : i32, i32
  }
  func.func @transform_13(%arg0: i32) -> (i32, i32) {
    %c0_i32 = arith.constant 0 : i32
    %c0_i32_0 = arith.constant 0 : i32
    %c0_i32_1 = arith.constant 0 : i32
    return %c0_i32, %c0_i32_0 : i32, i32
  }
  func.func @transform_14(%arg0: i32) -> (i32, i32) {
    %c0_i32 = arith.constant 0 : i32
    %c0_i32_0 = arith.constant 0 : i32
    %c0_i32_1 = arith.constant 0 : i32
    return %c0_i32, %c0_i32_0 : i32, i32
  }
  func.func @transform_15(%arg0: i32) -> (i32, i32) {
    %c0_i32 = arith.constant 0 : i32
    %c0_i32_0 = arith.constant 0 : i32
    %c0_i32_1 = arith.constant 0 : i32
    return %c0_i32, %c0_i32_0 : i32, i32
  }
  func.func @transform_16(%arg0: i32) -> (i32, i32) {
    %c0_i32 = arith.constant 0 : i32
    %c0_i32_0 = arith.constant 0 : i32
    %c0_i32_1 = arith.constant 0 : i32
    return %c0_i32, %c0_i32_0 : i32, i32
  }
  func.func @transform_17(%arg0: i32) -> (i32, i32) {
    %c0_i32 = arith.constant 0 : i32
    %c0_i32_0 = arith.constant 0 : i32
    %c0_i32_1 = arith.constant 0 : i32
    return %c0_i32, %c0_i32_0 : i32, i32
  }
  func.func @transform_18(%arg0: i32) -> (i32, i32) {
    %c0_i32 = arith.constant 0 : i32
    %c0_i32_0 = arith.constant 0 : i32
    %c0_i32_1 = arith.constant 0 : i32
    return %c0_i32, %c0_i32_0 : i32, i32
  }
  func.func @transform_19(%arg0: i32) -> (i32, i32) {
    %c0_i32 = arith.constant 0 : i32
    %c0_i32_0 = arith.constant 0 : i32
    %c0_i32_1 = arith.constant 0 : i32
    return %c0_i32, %c0_i32_0 : i32, i32
  }
  func.func @transform_20(%arg0: i32) -> (i32, i32, i32) {
    %c0_i32 = arith.constant 0 : i32
    %c0_i32_0 = arith.constant 0 : i32
    %c0_i32_1 = arith.constant 0 : i32
    return %arg0, %c0_i32, %c0_i32_0 : i32, i32, i32
  }
}

module attributes {stable_mosaic.version = 11 : i64} {
  func.func @_conf_kernel(%arg0: i32, %arg1: memref<1x8x16xf32, #tpu.memory_space<vmem>>, %arg2: memref<1x8x1xi32, #tpu.memory_space<vmem>>, %arg3: memref<1x8x1xi32, #tpu.memory_space<vmem>>, %arg4: memref<1x8x1xf32, #tpu.memory_space<vmem>>, %arg5: memref<1x8x1xf32, #tpu.memory_space<vmem>>) attributes {dimension_semantics = [#tpu.dimension_semantics<parallel>], iteration_bounds = array<i64: 1>, scalar_prefetch = 0 : i64, scratch_operands = 0 : i64, tpu.core_type = #tpu.core_type<tc>, window_params = [{transform_indices = @transform_0, window_bounds = array<i64: 1, 8, 16>}, {transform_indices = @transform_1, window_bounds = array<i64: 1, 8, 1>}, {transform_indices = @transform_2, window_bounds = array<i64: 1, 8, 1>}, {transform_indices = @transform_3, window_bounds = array<i64: 1, 8, 1>}, {transform_indices = @transform_4, window_bounds = array<i64: 1, 8, 1>}]} {
    %c0 = arith.constant 0 : index
    %c0_0 = arith.constant 0 : index
    %c0_1 = arith.constant 0 : index
    %0 = vector.load %arg1[%c0, %c0_0, %c0_1] : memref<1x8x16xf32, #tpu.memory_space<vmem>>, vector<1x8x16xf32>
    %1 = vector.shape_cast %0 : vector<1x8x16xf32> to vector<8x16xf32>
    %c0_2 = arith.constant 0 : index
    %c0_3 = arith.constant 0 : index
    %c0_4 = arith.constant 0 : index
    %2 = vector.load %arg2[%c0_2, %c0_3, %c0_4] : memref<1x8x1xi32, #tpu.memory_space<vmem>>, vector<1x8x1xi32>
    %3 = vector.shape_cast %2 : vector<1x8x1xi32> to vector<8x1xi32>
    %c0_5 = arith.constant 0 : index
    %c0_6 = arith.constant 0 : index
    %c0_7 = arith.constant 0 : index
    %4 = vector.load %arg3[%c0_5, %c0_6, %c0_7] : memref<1x8x1xi32, #tpu.memory_space<vmem>>, vector<1x8x1xi32>
    %5 = vector.shape_cast %4 : vector<1x8x1xi32> to vector<8x1xi32>
    %c0_8 = arith.constant 0 : index
    %c0_9 = arith.constant 0 : index
    %c0_10 = arith.constant 0 : index
    %6 = vector.load %arg4[%c0_8, %c0_9, %c0_10] : memref<1x8x1xf32, #tpu.memory_space<vmem>>, vector<1x8x1xf32>
    %7 = vector.shape_cast %6 : vector<1x8x1xf32> to vector<8x1xf32>
    %cst = arith.constant dense<0xFF800000> : vector<8xf32>
    %8 = vector.multi_reduction <maximumf>, %1, %cst [1] : vector<8x16xf32> to vector<8xf32>
    %9 = vector.shape_cast %8 : vector<8xf32> to vector<8x1xf32>
    %10 = vector.broadcast %9 : vector<8x1xf32> to vector<8x16xf32>
    %11 = arith.subf %1, %10 : vector<8x16xf32>
    %12 = math.exp %11 : vector<8x16xf32>
    %cst_11 = arith.constant dense<0.000000e+00> : vector<8xf32>
    %13 = vector.multi_reduction <add>, %12, %cst_11 [1] : vector<8x16xf32> to vector<8xf32>
    %14 = vector.shape_cast %13 : vector<8xf32> to vector<8x1xf32>
    %15 = math.log %14 : vector<8x1xf32>
    %16 = arith.addf %15, %9 : vector<8x1xf32>
    %17 = tpu.iota {dimensions = array<i32: 1>} : vector<8x16xi32>
    %18 = vector.broadcast %3 : vector<8x1xi32> to vector<8x16xi32>
    %19 = arith.cmpi eq, %17, %18 : vector<8x16xi32>
    %cst_12 = arith.constant 0.000000e+00 : f32
    %20 = vector.broadcast %cst_12 : f32 to vector<8x16xf32>
    %21 = arith.select %19, %1, %20 : vector<8x16xi1>, vector<8x16xf32>
    %cst_13 = arith.constant dense<0.000000e+00> : vector<8xf32>
    %22 = vector.multi_reduction <add>, %21, %cst_13 [1] : vector<8x16xf32> to vector<8xf32>
    %23 = vector.shape_cast %22 : vector<8xf32> to vector<8x1xf32>
    %24 = arith.subf %23, %16 : vector<8x1xf32>
    %c0_i32 = arith.constant 0 : i32
    %25 = vector.broadcast %c0_i32 : i32 to vector<8x1xi32>
    %26 = arith.cmpi sgt, %5, %25 : vector<8x1xi32>
    %cst_14 = arith.constant 1.000000e+30 : f32
    %27 = vector.broadcast %cst_14 : f32 to vector<8x1xf32>
    %28 = arith.select %26, %24, %27 : vector<8x1xi1>, vector<8x1xf32>
    %29 = arith.addf %28, %7 : vector<8x1xf32>
    %c0_15 = arith.constant 0 : index
    %c0_16 = arith.constant 0 : index
    %c0_17 = arith.constant 0 : index
    %30 = vector.load %arg5[%c0_15, %c0_16, %c0_17] : memref<1x8x1xf32, #tpu.memory_space<vmem>>, vector<1x8x1xf32>
    %31 = vector.shape_cast %30 : vector<1x8x1xf32> to vector<8x1xf32>
    %32 = vector.shape_cast %29 : vector<8x1xf32> to vector<1x8x1xf32>
    tpu.vector_store %arg5[%c0_15, %c0_16, %c0_17], %32 {strides = array<i32>} : memref<1x8x1xf32, #tpu.memory_space<vmem>>, vector<1x8x1xf32>,
    return
  }
  func.func @transform_0(%arg0: i32) -> (i32, i32, i32) {
    %c0_i32 = arith.constant 0 : i32
    %c0_i32_0 = arith.constant 0 : i32
    %c0_i32_1 = arith.constant 0 : i32
    return %arg0, %c0_i32, %c0_i32_0 : i32, i32, i32
  }
  func.func @transform_1(%arg0: i32) -> (i32, i32, i32) {
    %c0_i32 = arith.constant 0 : i32
    %c0_i32_0 = arith.constant 0 : i32
    %c0_i32_1 = arith.constant 0 : i32
    return %arg0, %c0_i32, %c0_i32_0 : i32, i32, i32
  }
  func.func @transform_2(%arg0: i32) -> (i32, i32, i32) {
    %c0_i32 = arith.constant 0 : i32
    %c0_i32_0 = arith.constant 0 : i32
    %c0_i32_1 = arith.constant 0 : i32
    return %arg0, %c0_i32, %c0_i32_0 : i32, i32, i32
  }
  func.func @transform_3(%arg0: i32) -> (i32, i32, i32) {
    %c0_i32 = arith.constant 0 : i32
    %c0_i32_0 = arith.constant 0 : i32
    %c0_i32_1 = arith.constant 0 : i32
    return %arg0, %c0_i32, %c0_i32_0 : i32, i32, i32
  }
  func.func @transform_4(%arg0: i32) -> (i32, i32, i32) {
    %c0_i32 = arith.constant 0 : i32
    %c0_i32_0 = arith.constant 0 : i32
    %c0_i32_1 = arith.constant 0 : i32
    return %arg0, %c0_i32, %c0_i32_0 : i32, i32, i32
  }
}

module attributes {stable_mosaic.version = 11 : i64} {
  func.func @_decode_kernel(%arg0: i32, %arg1: memref<1x8x35xf32, #tpu.memory_space<vmem>>, %arg2: memref<35x32xbf16, #tpu.memory_space<vmem>>, %arg3: memref<1x32xf32, #tpu.memory_space<vmem>>, %arg4: memref<32x24xbf16, #tpu.memory_space<vmem>>, %arg5: memref<1x24xf32, #tpu.memory_space<vmem>>, %arg6: memref<1x8x24xf32, #tpu.memory_space<vmem>>) attributes {dimension_semantics = [#tpu.dimension_semantics<parallel>], iteration_bounds = array<i64: 1>, scalar_prefetch = 0 : i64, scratch_operands = 0 : i64, tpu.core_type = #tpu.core_type<tc>, window_params = [{transform_indices = @transform_0, window_bounds = array<i64: 1, 8, 35>}, {pipeline_mode = #tpu.pipeline_mode<synchronous>, transform_indices = @transform_1, window_bounds = array<i64: 35, 32>}, {pipeline_mode = #tpu.pipeline_mode<synchronous>, transform_indices = @transform_2, window_bounds = array<i64: 1, 32>}, {pipeline_mode = #tpu.pipeline_mode<synchronous>, transform_indices = @transform_3, window_bounds = array<i64: 32, 24>}, {pipeline_mode = #tpu.pipeline_mode<synchronous>, transform_indices = @transform_4, window_bounds = array<i64: 1, 24>}, {transform_indices = @transform_5, window_bounds = array<i64: 1, 8, 24>}]} {
    %c0 = arith.constant 0 : index
    %c0_0 = arith.constant 0 : index
    %c0_1 = arith.constant 0 : index
    %0 = vector.load %arg1[%c0, %c0_0, %c0_1] : memref<1x8x35xf32, #tpu.memory_space<vmem>>, vector<1x8x35xf32>
    %1 = vector.shape_cast %0 : vector<1x8x35xf32> to vector<8x35xf32>
    %2 = arith.truncf %1 : vector<8x35xf32> to vector<8x35xbf16>
    %c0_2 = arith.constant 0 : index
    %c0_3 = arith.constant 0 : index
    %3 = vector.load %arg2[%c0_2, %c0_3] : memref<35x32xbf16, #tpu.memory_space<vmem>>, vector<35x32xbf16>
    %cst = arith.constant dense<0.000000e+00> : vector<8x32xf32>
    %4 = tpu.matmul %2, %3, %cst {dimension_numbers = #tpu.dot_dimension_numbers<[1], [0], [0], [1], [0, 0, 1, 1], [], []>} : vector<8x35xbf16>, vector<35x32xbf16>, vector<8x32xf32> -> vector<8x32xf32>
    %c0_4 = arith.constant 0 : index
    %c0_5 = arith.constant 0 : index
    %5 = vector.load %arg3[%c0_4, %c0_5] : memref<1x32xf32, #tpu.memory_space<vmem>>, vector<1x32xf32>
    %6 = vector.broadcast %5 : vector<1x32xf32> to vector<8x32xf32>
    %7 = arith.addf %4, %6 : vector<8x32xf32>
    %8 = arith.mulf %7, %7 : vector<8x32xf32>
    %9 = arith.mulf %7, %8 : vector<8x32xf32>
    %cst_6 = arith.constant 4.471500e-02 : f32
    %10 = vector.broadcast %cst_6 : f32 to vector<8x32xf32>
    %11 = arith.mulf %10, %9 : vector<8x32xf32>
    %12 = arith.addf %7, %11 : vector<8x32xf32>
    %cst_7 = arith.constant 0.797884583 : f32
    %13 = vector.broadcast %cst_7 : f32 to vector<8x32xf32>
    %14 = arith.mulf %13, %12 : vector<8x32xf32>
    %15 = math.tanh %14 : vector<8x32xf32>
    %cst_8 = arith.constant 1.000000e+00 : f32
    %16 = vector.broadcast %cst_8 : f32 to vector<8x32xf32>
    %17 = arith.addf %16, %15 : vector<8x32xf32>
    %cst_9 = arith.constant 5.000000e-01 : f32
    %18 = vector.broadcast %cst_9 : f32 to vector<8x32xf32>
    %19 = arith.mulf %18, %17 : vector<8x32xf32>
    %20 = arith.mulf %7, %19 : vector<8x32xf32>
    %21 = arith.truncf %20 : vector<8x32xf32> to vector<8x32xbf16>
    %c0_10 = arith.constant 0 : index
    %c0_11 = arith.constant 0 : index
    %22 = vector.load %arg4[%c0_10, %c0_11] : memref<32x24xbf16, #tpu.memory_space<vmem>>, vector<32x24xbf16>
    %cst_12 = arith.constant dense<0.000000e+00> : vector<8x24xf32>
    %23 = tpu.matmul %21, %22, %cst_12 {dimension_numbers = #tpu.dot_dimension_numbers<[1], [0], [0], [1], [0, 0, 1, 1], [], []>} : vector<8x32xbf16>, vector<32x24xbf16>, vector<8x24xf32> -> vector<8x24xf32>
    %c0_13 = arith.constant 0 : index
    %c0_14 = arith.constant 0 : index
    %24 = vector.load %arg5[%c0_13, %c0_14] : memref<1x24xf32, #tpu.memory_space<vmem>>, vector<1x24xf32>
    %25 = vector.broadcast %24 : vector<1x24xf32> to vector<8x24xf32>
    %26 = arith.addf %23, %25 : vector<8x24xf32>
    %c0_15 = arith.constant 0 : index
    %c0_16 = arith.constant 0 : index
    %c0_17 = arith.constant 0 : index
    %27 = vector.load %arg6[%c0_15, %c0_16, %c0_17] : memref<1x8x24xf32, #tpu.memory_space<vmem>>, vector<1x8x24xf32>
    %28 = vector.shape_cast %27 : vector<1x8x24xf32> to vector<8x24xf32>
    %29 = vector.shape_cast %26 : vector<8x24xf32> to vector<1x8x24xf32>
    tpu.vector_store %arg6[%c0_15, %c0_16, %c0_17], %29 {strides = array<i32>} : memref<1x8x24xf32, #tpu.memory_space<vmem>>, vector<1x8x24xf32>,
    return
  }
  func.func @transform_0(%arg0: i32) -> (i32, i32, i32) {
    %c0_i32 = arith.constant 0 : i32
    %c0_i32_0 = arith.constant 0 : i32
    %c0_i32_1 = arith.constant 0 : i32
    return %arg0, %c0_i32, %c0_i32_0 : i32, i32, i32
  }
  func.func @transform_1(%arg0: i32) -> (i32, i32) {
    %c0_i32 = arith.constant 0 : i32
    %c0_i32_0 = arith.constant 0 : i32
    %c0_i32_1 = arith.constant 0 : i32
    return %c0_i32, %c0_i32_0 : i32, i32
  }
  func.func @transform_2(%arg0: i32) -> (i32, i32) {
    %c0_i32 = arith.constant 0 : i32
    %c0_i32_0 = arith.constant 0 : i32
    %c0_i32_1 = arith.constant 0 : i32
    return %c0_i32, %c0_i32_0 : i32, i32
  }
  func.func @transform_3(%arg0: i32) -> (i32, i32) {
    %c0_i32 = arith.constant 0 : i32
    %c0_i32_0 = arith.constant 0 : i32
    %c0_i32_1 = arith.constant 0 : i32
    return %c0_i32, %c0_i32_0 : i32, i32
  }
  func.func @transform_4(%arg0: i32) -> (i32, i32) {
    %c0_i32 = arith.constant 0 : i32
    %c0_i32_0 = arith.constant 0 : i32
    %c0_i32_1 = arith.constant 0 : i32
    return %c0_i32, %c0_i32_0 : i32, i32
  }
  func.func @transform_5(%arg0: i32) -> (i32, i32, i32) {
    %c0_i32 = arith.constant 0 : i32
    %c0_i32_0 = arith.constant 0 : i32
    %c0_i32_1 = arith.constant 0 : i32
    return %arg0, %c0_i32, %c0_i32_0 : i32, i32, i32
  }
}

</mosaic_0001>

<bundles_post_ra>
// kernel: custom-call
= control target key start
LH: loop header
LB: loop body
LE: loop exit
PB: predicated region body
PF: predicated region fallthrough
CT: control target
= control target key end

     0   :  { %s6_s0 = inlined_call_operand.vmem [shape: pred[1,8], index: 0, kind: output, shape index: {}]  }

// kernel: custom-call.2
= control target key start
LH: loop header
LB: loop body
LE: loop exit
PB: predicated region body
PF: predicated region fallthrough
CT: control target
= control target key end

     0   :  { %s6_s0 = inlined_call_operand.vmem [shape: f32[1,8,3], index: 0, kind: output, shape index: {}]  }

// kernel: custom-call.1
= control target key start
LH: loop header
LB: loop body
LE: loop exit
PB: predicated region body
PF: predicated region fallthrough
CT: control target
= control target key end

     0   :  { %s6_s0 = inlined_call_operand.vmem [shape: s32[1,8], index: 0, kind: output, shape index: {}]  }

// kernel: closed_call.48
= control target key start
LH: loop header
LB: loop body
LE: loop exit
PB: predicated region body
PF: predicated region fallthrough
CT: control target
= control target key end

     0   :  { %vm21_vm0 = vcmask 130048   ;;  %v60_v1 = vmov 0   ;;  %v34_v9 = vlaneseq  ;;  %vm48_vm3 = vcmask 7168   ;;  %s104_s0 = inlined_call_operand.vmem [shape: f32[1,8,16], index: 0, kind: input, shape index: {}]   ;;  %s105_s1 = inlined_call_operand.vmem [shape: s32[1,8,1], index: 1, kind: input, shape index: {}]   ;;  %s106_s2 = inlined_call_operand.vmem [shape: s32[1,8,1], index: 2, kind: input, shape index: {}]   ;;  %s107_s3 = inlined_call_operand.vmem [shape: f32[1,8,1], index: 3, kind: input, shape index: {}]   ;;  %s108_s4 = inlined_call_operand.vmem [shape: f32[1,8,1], index: 4, kind: output, shape index: {}]  }
   0x1   :  { %v17_v0 = vld [vmem:[%s104_s0] sm:$0xff]  ;;  %55 = vset.pattern.permute.xlu0 %v60_v1 }
   0x2   :  { %v22_v2 = vsel %vm21_vm0, %v17_v0, -inf  ;;  %v18_v3 = vld [vmem:[%s105_s1] sm:$0xff]  ;;  %v35_v10 = vand.u32 127, %v34_v9 }
   0x3   :  { %23 = vmax.xlane.f32.xlu0 %v22_v2  ;;  %v19_v17 = vld [vmem:[%s106_s2] sm:$0xff] }
   0x4   :  { %vm45_vm2 = vcmp.gt.s32.totalorder %v19_v17, 0  ;;  %v20_v20 = vld [vmem:[%s107_s3] sm:$0xff] }
  0x17   :  { %37 = vperm.xlu0 %55, %v18_v3  }
  0x76   :  { %v24_v4 = vpop.xlane.xlu0 %23 }
  0x77   :  { %v25_v5 = vsub.f32 %v17_v0, %v24_v4 }
  0x79   :  { %v26_v6 = vmul.f32 1.442695, %v25_v5 }
  0x7b   :  { %56 = vpow2.f32 %v26_v6 }
  0x81   :  { %v57_v7 = vpop.eup %56 }
  0x82   :  { %v28_v8 = vsel %vm21_vm0, %v57_v7, 0.0 }
  0x83   :  { %29 = vadd.xlane.f32.xlu1 %v28_v8 }
  0x89   :  { %v38_v11 = vpop.permute.xlu0 %37 }
  0x8a   :  { %vm39_vm1 = vcmp.eq.s32.totalorder %v35_v10, %v38_v11 }
  0x8b   :  { %v40_v12 = vsel %vm39_vm1, %v17_v0, 0.0 }
  0x8c   :  { %v41_v13 = vsel %vm21_vm0, %v40_v12, 0.0 }
  0x8d   :  { %42 = vadd.xlane.f32.xlu1 %v41_v13 }
  0xf6   :  { %v30_v14 = vpop.xlane.xlu1 %29 }
  0xf7   :  { %58 = vlog2.f32 %v30_v14 }
  0xfd   :  { %v59_v15 = vpop.eup %58 }
  0xfe   :  { %v32_v16 = vmul.f32 0.6931472, %v59_v15 }
 0x100   :  { %v33_v18 = vadd.f32 %v32_v16, %v24_v4  ;;  %v43_v19 = vpop.xlane.xlu1 %42 }
 0x102   :  { %v44_v21 = vsub.f32 %v43_v19, %v33_v18 }
 0x104   :  { %v46_v22 = vsel %vm45_vm2, %v44_v21, 1e+30 }
 0x105   :  { %v47_v23 = vadd.f32 %v46_v22, %v20_v20 }
 0x107   :  { %49 = vst.msk [vmem:[%s108_s4] sm:$0xff] %vm48_vm3, %v47_v23 }

// kernel: fwd.1
= control target key start
LH: loop header
LB: loop body
LE: loop exit
PB: predicated region body
PF: predicated region fallthrough
CT: control target
= control target key end

     0   :  { %vm51_vm0 = vcmask 1040384   ;;  %vm52_vm1 = vcmask 1041408   ;;  %v151_v1 = vmov 65535   ;;  %vm47_vm2 = vcmask 285696   ;;  %s209_s1 = inlined_call_operand.vmem [shape: bf16[35,32], index: 1, kind: input, shape index: {}]   ;;  %s210_s2 = inlined_call_operand.vmem [shape: f32[1,32], index: 2, kind: input, shape index: {}]   ;;  %s211_s0 = inlined_call_operand.vmem [shape: f32[1,8,35], index: 0, kind: input, shape index: {}]   ;;  %s212_s4 = inlined_call_operand.vmem [shape: f32[1,24], index: 4, kind: input, shape index: {}]   ;;  %s213_s3 = inlined_call_operand.vmem [shape: bf16[32,24], index: 3, kind: input, shape index: {}]   ;;  %s214_s5 = inlined_call_operand.vmem [shape: f32[1,8,24], index: 5, kind: output, shape index: {}]  }
   0x1   :  { %v27_v0 = vld [vmem:[%s209_s1 + $0x10] sm:$0x3]  ;;  %v53_v2 = vsel %vm51_vm0, 4294967295, %v151_v1  ;;  %v143_v7 = vld [vmem:[%s209_s1 + $0x8] sm:$0xff]  ;;  %v142_v8 = vld [vmem:[%s209_s1] sm:$0xff]  ;;  %vm101_vm3 = vcmask 261120  }
   0x2   :  { %v41_v3 = vunpack.c.l.b16 %v27_v0  ;;  %v54_v4 = vsel %vm52_vm1, %v53_v2, 0  ;;  %v21_v9 = vld [vmem:[%s211_s0] sm:$0xff]  ;;  %v145_v11 = vld [vmem:[%s213_s3 + $0x8] sm:$0xff]  ;;  %vm118_vm4 = vcmask 195584  }
   0x3   :  { %v22_v10 = vpack.c.bf16 %v21_v9, %v21_v9  ;;  %111 = vmatpush.bf16.msra.mxu1 %v145_v11  ;;  %v144_v12 = vld [vmem:[%s213_s3] sm:$0xff] }
   0x4   :  { %v44_v5 = vpack.c.b16 %v41_v3, %v41_v3  ;;  %v147_v13 = vld [vmem:[%s210_s2] ss:$0 sm:$0xff] }
   0x5   :  { %v148_v27 = vld [vmem:[%s212_s4] ss:$0 sm:$0xff] }
   0x6   :  { %v56_v6 = vand.u32 %v54_v4, %v44_v5 }
   0x7   :  { %112 = vmatpush.bf16.msra.mxu1 %v144_v12 }
   0x8   :  { %63 = vmatpush.bf16.msra.mxu0 %v56_v6 }
   0xc   :  { %64 = vmatpush.bf16.msra.mxu0 %v143_v7 }
  0x10   :  { %65 = vmatpush.bf16.msra.mxu0 %v142_v8 }
  0x13   :  { %132 = vmatmul.msk.bf16.vlgmr.msra.gmra.mxu0 %vm47_vm2, %v22_v10 }
  0x90   :  { %v67_v14 = vpop.f32.mrf.mxu0 }
  0x91   :  { %v68_v15 = vadd.f32 %v147_v13, %v67_v14 }
  0x93   :  { %v71_v16 = vmul.f32 %v68_v15, %v68_v15 }
  0x95   :  { %v72_v17 = vmul.f32 %v71_v16, %v68_v15 }
  0x97   :  { %v73_v18 = vmul.f32 0.044715, %v72_v17 }
  0x98   :  { %v69_v19 = vpop.f32.mrf.mxu0 }
  0x99   :  { %v74_v20 = vadd.f32 %v73_v18, %v68_v15 }
  0x9b   :  { %v75_v21 = vmul.f32 0.7978846, %v74_v20 }
  0x9d   :  { %149 = vtanh.f32 %v75_v21 }
  0xa3   :  { %v150_v22 = vpop.eup %149 }
  0xa4   :  { %v77_v23 = vadd.f32 1.0, %v150_v22 }
  0xa6   :  { %v78_v24 = vmul.f32 0.5, %v77_v23 }
  0xa8   :  { %v79_v25 = vmul.f32 %v78_v24, %v68_v15 }
  0xaa   :  { %v80_v26 = vpack.c.bf16 %v79_v25, %v79_v25 }
  0xac   :  { %141 = vmatmul.msk.bf16.vlgmr.msra.gmra.mxu1 %vm101_vm3, %v80_v26 }
 0x129   :  { %v114_v28 = vpop.f32.mrf.mxu1 }
 0x12a   :  { %v115_v29 = vadd.f32 %v148_v27, %v114_v28 }
 0x12c   :  { %119 = vst.msk [vmem:[%s214_s5] sm:$0xff] %vm118_vm4, %v115_v29 }
 0x131   :  { %v116_v30 = vpop.f32.mrf.mxu1 }

// kernel: closed_call.47
= control target key start
LH: loop header
LB: loop body
LE: loop exit
PB: predicated region body
PF: predicated region fallthrough
CT: control target
= control target key end

     0   :  { %vm79_vm0 = vcmask 1040384   ;;  %vm80_vm1 = vcmask 1041408   ;;  %v628_v1 = vmov 65535   ;;  %vm75_vm2 = vcmask 23552   ;;  %s854_s3 = inlined_call_operand.vmem [shape: bf16[3,32], index: 3, kind: input, shape index: {}]   ;;  %s855_s1 = inlined_call_operand.vmem [shape: f32[1,8,3], index: 1, kind: input, shape index: {}]   ;;  %s856_s4 = inlined_call_operand.vmem [shape: f32[1,32], index: 4, kind: input, shape index: {}]   ;;  %s857_s6 = inlined_call_operand.vmem [shape: f32[1,32], index: 6, kind: input, shape index: {}]   ;;  %s858_s5 = inlined_call_operand.vmem [shape: bf16[32,32], index: 5, kind: input, shape index: {}]   ;;  %s859_s2 = inlined_call_operand.vmem [shape: f32[1,8,1], index: 2, kind: input, shape index: {}]   ;;  %s860_s9 = inlined_call_operand.vmem [shape: f32[1,32], index: 9, kind: input, shape index: {}]   ;;  %s861_s8 = inlined_call_operand.vmem [shape: bf16[32,32], index: 8, kind: input, shape index: {}]   ;;  %s862_s10 = inlined_call_operand.vmem [shape: bf16[32,64], index: 10, kind: input, shape index: {}]   ;;  %s863_s7 = inlined_call_operand.vmem [shape: f32[8,32], index: 7, kind: input, shape index: {}]   ;;  %s864_s11 = inlined_call_operand.vmem [shape: f32[1,64], index: 11, kind: input, shape index: {}]   ;;  %s865_s0 = inlined_call_operand.vmem [shape: f32[1,8,32], index: 0, kind: input, shape index: {}]   ;;  %s866_s12 = inlined_call_operand.vmem [shape: bf16[32,32], index: 12, kind: input, shape index: {}]   ;;  %s867_s13 = inlined_call_operand.vmem [shape: f32[1,32], index: 13, kind: input, shape index: {}]   ;;  %s868_s15 = inlined_call_operand.vmem [shape: f32[1,128], index: 15, kind: input, shape index: {}]   ;;  %s869_s14 = inlined_call_operand.vmem [shape: bf16[32,128], index: 14, kind: input, shape index: {}]   ;;  %s870_s16 = inlined_call_operand.vmem [shape: bf16[128,32], index: 16, kind: input, shape index: {}]   ;;  %s871_s17 = inlined_call_operand.vmem [shape: f32[1,32], index: 17, kind: input, shape index: {}]   ;;  %s872_s19 = inlined_call_operand.vmem [shape: f32[1,19], index: 19, kind: input, shape index: {}]   ;;  %s873_s18 = inlined_call_operand.vmem [shape: bf16[32,19], index: 18, kind: input, shape index: {}]   ;;  %s874_s20 = inlined_call_operand.vmem [shape: f32[1,8,19], index: 20, kind: output, shape index: {}]  }
   0x1   :  { %876 = sst [smem:[#allocation2_spill]] %s854_s3  ;;  %v81_v2 = vsel %vm79_vm0, 4294967295, %v628_v1  ;;  %v68_v9 = vld [vmem:[%s859_s2] sm:$0xff]  ;;  %v629_v11 = vmov 0   ;;  %vm129_vm3 = vcmask 261120   ;;  %v591_v26 = vld [vmem:[%s861_s8 + $0x8] sm:$0xff] }
   0x2   :  { %877 = sst [smem:[#allocation3_spill]] %s855_s1  ;;  %v82_v4 = vsel %vm80_vm1, %v81_v2, 0  ;;  %611 = vset.pattern.permute.xlu0 %v629_v11  ;;  %v146_v12 = vsub.f32 1.0, %v68_v9  ;;  %v593_v27 = vld [vmem:[%s862_s10 + $0x8] sm:$0xff]  ;;  %v590_v28 = vld [vmem:[%s861_s8] sm:$0xff]  ;;  %vm251_vm4 = vcmask 64512  }
   0x3   :  { %878 = sst [smem:[#allocation4_spill]] %s856_s4  ;;  %222 = vmatpush.bf16.msra.mxu3 %v593_v27  ;;  %v592_v29 = vld [vmem:[%s862_s10] sm:$0xff]  ;;  %v595_v61 = vld [vmem:[%s866_s12 + $0x8] sm:$0xff]  ;;  %vm270_vm5 = vcmask 1043456   ;;  %vm493_vm6 = vcmask 154624  }
   0x4   :  { %879 = sst [smem:[#allocation5_spill]] %s857_s6  ;;  %149 = vperm.xlu0 %611, %v146_v12   ;;  %v770_v30 = vld [vmem:[%s863_s7] sm:$0xff] }
   0x5   :  { %880 = sst [smem:[#allocation6_spill]] %s858_s5  ;;  %v155_v31 = vpack.c.bf16 %v770_v30, %v770_v30  ;;  %v66_v36 = vld [vmem:[%s865_s0] sm:$0xff]  ;;  %s630_s0 = smov 96  }
   0x6   :  { %s881_s23 = sld [smem:[#allocation2_spill]]  ;;  %v615_v43 = vld [vmem:[%s864_s11] ss:$0 sm:$0xff] }
   0x7   :  { %s882_s25 = sld [smem:[#allocation3_spill]]  ;;  %223 = vmatpush.bf16.msra.mxu3 %v592_v29  ;;  %v614_v45 = vld [vmem:[%s860_s9] ss:$0 sm:$0xff] }
   0x8   :  { %s883_s27 = sld [smem:[#allocation6_spill]]  ;;  %v596_v9 = vld [vmem:[%s869_s14] sm:$0xff] }
   0x9   :  { %s884_s1 = sld [smem:[#allocation4_spill]]  ;;  %v616_v11 = vld [vmem:[%s867_s13] ss:$0 sm:$0xff] }
   0xa   :  { %s885_s30 = sld [smem:[#allocation5_spill]] }
   0xc   :  { %v70_v0 = vld [vmem:[%s881_s23] sm:$0x3] }
   0xd   :  { %v67_v3 = vld [vmem:[%s882_s25] sm:$0xff]  ;;  %v84_v5 = vand.u32 %v82_v4, %v70_v0 }
   0xe   :  { %v69_v6 = vpack.c.bf16 %v67_v3, %v67_v3  ;;  %v589_v7 = vld [vmem:[%s883_s27 + $0x8] sm:$0xff]  ;;  %v588_v8 = vld [vmem:[%s883_s27] sm:$0xff] }
   0xf   :  { %93 = vmatpush.bf16.msra.mxu2 %v84_v5  ;;  %139 = vmatpush.bf16.msra.mxu1 %v589_v7  ;;  %v612_v10 = vld [vmem:[%s884_s1] ss:$0 sm:$0xff] }
  0x10   :  { %v613_v32 = vld [vmem:[%s885_s30] ss:$0 sm:$0xff] }
  0x11   :  { %v594_v4 = vld [vmem:[%s866_s12] sm:$0xff] }
  0x12   :  { %499 = vmatmul.msk.bf16.vlgmr.msra.gmra.mxu2 %vm75_vm2, %v69_v6 }
  0x13   :  { %140 = vmatpush.bf16.msra.mxu1 %v588_v8  ;;  %185 = vmatpush.bf16.msrb.mxu2 %v591_v26  ;;  %v597_v8 = vld [vmem:[%s869_s14 + $0x8] sm:$0xff] }
  0x14   :  { %356 = vmatpush.bf16.msrb.mxu3 %v597_v8 }
  0x17   :  { %186 = vmatpush.bf16.msrb.mxu2 %v590_v28 }
  0x18   :  { %357 = vmatpush.bf16.msrb.mxu3 %v596_v9 }
  0x1b   :  { %313 = vmatpush.bf16.msra.mxu2 %v595_v61 }
  0x1f   :  { %314 = vmatpush.bf16.msra.mxu2 %v594_v4 }
  0x22   :  { %517 = vmatmul.msk.bf16.vlgmr.msrb.gmra.mxu2 %vm129_vm3, %v155_v31 }
  0x76   :  { %v150_v34 = vpop.permute.xlu0 %149 }
  0x95   :  { %v95_v13 = vpop.f32.mrf.mxu2 }
  0x96   :  { %v96_v14 = vadd.f32 %v612_v10, %v95_v13  ;;  %v605_v10 = vld [vmem:[%s870_s16 + $0x38] sm:$0xff] }
  0x98   :  { %v99_v15 = vmul.f32 %v96_v14, %v96_v14 }
  0x9a   :  { %v100_v16 = vmul.f32 %v99_v15, %v96_v14 }
  0x9c   :  { %v101_v17 = vmul.f32 0.044715, %v100_v16 }
  0x9d   :  { %v97_v18 = vpop.f32.mrf.mxu2 }
  0x9e   :  { %v102_v19 = vadd.f32 %v101_v17, %v96_v14  ;;  %v604_v17 = vld [vmem:[%s870_s16 + $0x30] sm:$0xff]  ;;  %v603_v18 = vld [vmem:[%s870_s16 + $0x28] sm:$0xff] }
  0xa0   :  { %v103_v20 = vmul.f32 0.7978846, %v102_v19  ;;  %v602_v19 = vld [vmem:[%s870_s16 + $0x20] sm:$0xff] }
  0xa2   :  { %620 = vtanh.f32 %v103_v20  ;;  %v601_v20 = vld [vmem:[%s870_s16 + $0x18] sm:$0xff] }
  0xa5   :  { %v188_v41 = vpop.f32.mrf.mxu2 }
  0xa6   :  { %v189_v48 = vadd.f32 %v614_v45, %v188_v41 }
  0xa8   :  { %v621_v21 = vpop.eup %620  ;;  %v229_v51 = vpack.c.bf16 %v189_v48, %v189_v48 }
  0xa9   :  { %v105_v22 = vadd.f32 1.0, %v621_v21  ;;  %v600_v21 = vld [vmem:[%s870_s16 + $0x10] sm:$0xff] }
  0xab   :  { %v106_v23 = vmul.f32 0.5, %v105_v22  ;;  %v599_v22 = vld [vmem:[%s870_s16 + $0x8] sm:$0xff] }
  0xad   :  { %v107_v24 = vmul.f32 %v106_v23, %v96_v14  ;;  %v190_v42 = vpop.f32.mrf.mxu2  ;;  %v598_v23 = vld [vmem:[%s870_s16] sm:$0xff] }
  0xaf   :  { %v108_v25 = vpack.c.bf16 %v107_v24, %v107_v24  ;;  %v617_v24 = vld [vmem:[%s868_s15] ss:$0 sm:$0xff] }
  0xb1   :  { %508 = vmatmul.msk.bf16.vlgmr.msra.gmra.mxu1 %vm129_vm3, %v108_v25 }
 0x12e   :  { %v142_v33 = vpop.f32.mrf.mxu1 }
 0x12f   :  { %v143_v35 = vadd.f32 %v613_v32, %v142_v33 }
 0x131   :  { %v152_v37 = vmul.f32 %v150_v34, %v143_v35 }
 0x133   :  { %v153_v38 = vadd.f32 %v152_v37, %v66_v36 }
 0x135   :  { %v192_v39 = vpack.c.bf16 %v153_v38, %v153_v38  ;;  %v607_v38 = vld [vmem:[%s873_s18 + $0x8] sm:$0xff] }
 0x136   :  { %v144_v40 = vpop.f32.mrf.mxu1 }
 0x137   :  { %526 = vmatmul.msk.bf16.vlgmr.msra.gmra.mxu3 %vm129_vm3, %v192_v39  ;;  %v606_v39 = vld [vmem:[%s873_s18] sm:$0xff] }
 0x138   :  { %v618_v40 = vld [vmem:[%s871_s17] ss:$0 sm:$0xff] }
 0x1ba   :  { %v225_v44 = vpop.f32.mrf.mxu3 }
 0x1bb   :  { %v226_v46 = vadd.f32 %v615_v43, %v225_v44 }
 0x1bd   :  { %v230_v47 = vpack.c.bf16 %v226_v46, %v226_v46  ;;  %v619_v46 = vld [vmem:[%s872_s19] ss:$0 sm:$0xff] }
 0x1bf   :  { %v235_v49 = vsel %vm129_vm3, %v230_v47, 0 }
 0x1c0   :  { %244 = vmatpush.bf16.xpose.msra.mxu0 %v235_v49 }
 0x1c2   :  { %v227_v50 = vpop.f32.mrf.mxu3 }
 0x1c7   :  { %527 = vmatmul.msk.bf16.vlgmr.msra.gmra.mxu0 %vm129_vm3, %v229_v51 }
 0x1c8   :  { %437 = vmatpush.bf16.msrb.mxu0 %v605_v10 }
 0x1cc   :  { %438 = vmatpush.bf16.msrb.mxu0 %v604_v17 }
 0x1d0   :  { %439 = vmatpush.bf16.msrb.mxu0 %v603_v18 }
 0x1d4   :  { %440 = vmatpush.bf16.msrb.mxu0 %v602_v19 }
 0x1d8   :  { %441 = vmatpush.bf16.msrb.mxu0 %v601_v20 }
 0x1dc   :  { %442 = vmatpush.bf16.msrb.mxu0 %v600_v21 }
 0x1e0   :  { %443 = vmatpush.bf16.msrb.mxu0 %v599_v22 }
 0x1e4   :  { %444 = vmatpush.bf16.msrb.mxu0 %v598_v23 }
 0x244   :  { %v246_v52 = vpop.f32.mrf.mxu0 }
 0x245   :  { %v250_v53 = vmul.f32 0.17677669, %v246_v52 }
 0x247   :  { %v252_v54 = vsel %vm251_vm4, %v250_v53, -inf }
 0x248   :  { %253 = vmax.xlane.f32.xlu0 %v252_v54 }
 0x24c   :  { %v248_v55 = vpop.f32.mrf.mxu0 }
 0x2bb   :  { %v254_v56 = vpop.xlane.xlu0 %253 }
 0x2bc   :  { %v255_v57 = vsub.f32 %v250_v53, %v254_v56 }
 0x2be   :  { %v256_v58 = vmul.f32 1.442695, %v255_v57 }
 0x2c0   :  { %622 = vpow2.f32 %v256_v58 }
 0x2c6   :  { %v623_v59 = vpop.eup %622 }
 0x2c7   :  { %v258_v60 = vsel %vm251_vm4, %v623_v59, 0.0 }
 0x2c8   :  { %259 = vadd.xlane.f32.xlu1 %v258_v60 }
 0x2e1   :  { %265 = vrot.lane.b32.xlu1 %v230_v47, %s630_s0 }
 0x33b   :  { %v260_v62 = vpop.xlane.xlu1 %259 }
 0x33c   :  { %624 = vrcp.f32 %v260_v62 }
 0x342   :  { %v625_v63 = vpop.eup %624 }
 0x343   :  { %v262_v0 = vmul.f32 %v625_v63, %v623_v59 }
 0x345   :  { %v263_v3 = vpack.c.bf16 %v262_v0, %v262_v0 }
 0x353   :  { %v266_v1 = vpop.permute.xlu1 %265 }
 0x354   :  { %v272_v2 = vsel %vm270_vm5, %v266_v1, 0 }
 0x355   :  { %281 = vmatpush.bf16.msrb.mxu1 %v272_v2 }
 0x358   :  { %528 = vmatmul.msk.bf16.vlgmr.msrb.gmra.mxu1 %vm251_vm4, %v263_v3 }
 0x359   :  { %486 = vmatpush.bf16.msra.mxu1 %v607_v38 }
 0x35d   :  { %487 = vmatpush.bf16.msra.mxu1 %v606_v39 }
 0x3d5   :  { %v283_v5 = vpop.f32.mrf.mxu1 }
 0x3d6   :  { %v287_v6 = vpack.c.bf16 %v283_v5, %v283_v5 }
 0x3d8   :  { %537 = vmatmul.msk.bf16.vlgmr.msra.gmra.mxu2 %vm129_vm3, %v287_v6 }
 0x3dd   :  { %v285_v7 = vpop.f32.mrf.mxu1 }
 0x45b   :  { %v316_v12 = vpop.f32.mrf.mxu2 }
 0x45c   :  { %v320_v13 = vadd.f32 %v316_v12, %v770_v30 }
 0x45e   :  { %v325_v14 = vadd.f32 %v616_v11, %v320_v13 }
 0x460   :  { %v326_v15 = vpack.c.bf16 %v325_v14, %v325_v14 }
 0x462   :  { %546 = vmatmul.msk.bf16.vlgmr.msrb.gmra.mxu3 %vm129_vm3, %v326_v15 }
 0x463   :  { %v318_v16 = vpop.f32.mrf.mxu2 }
 0x4e5   :  { %v359_v25 = vpop.f32.mrf.mxu3 }
 0x4e6   :  { %v360_v26 = vadd.f32 %v617_v24, %v359_v25 }
 0x4e8   :  { %v363_v27 = vmul.f32 %v360_v26, %v360_v26 }
 0x4ea   :  { %v364_v28 = vmul.f32 %v363_v27, %v360_v26 }
 0x4ec   :  { %v365_v29 = vmul.f32 0.044715, %v364_v28 }
 0x4ed   :  { %v361_v30 = vpop.f32.mrf.mxu3 }
 0x4ee   :  { %v366_v31 = vadd.f32 %v365_v29, %v360_v26 }
 0x4f0   :  { %v367_v32 = vmul.f32 0.7978846, %v366_v31 }
 0x4f2   :  { %626 = vtanh.f32 %v367_v32 }
 0x4f8   :  { %v627_v33 = vpop.eup %626 }
 0x4f9   :  { %v369_v34 = vadd.f32 1.0, %v627_v33 }
 0x4fb   :  { %v370_v35 = vmul.f32 0.5, %v369_v34 }
 0x4fd   :  { %v371_v36 = vmul.f32 %v370_v35, %v360_v26 }
 0x4ff   :  { %v372_v37 = vpack.c.bf16 %v371_v36, %v371_v36 }
 0x501   :  { %445 = vmatmul.bf16.vlgmr.msrb.gmra.mxu0 %v372_v37 }
 0x57e   :  { %v446_v41 = vpop.f32.mrf.mxu0 }
 0x57f   :  { %v450_v42 = vadd.f32 %v446_v41, %v325_v14 }
 0x581   :  { %v455_v43 = vadd.f32 %v618_v40, %v450_v42 }
 0x583   :  { %v456_v44 = vpack.c.bf16 %v455_v43, %v455_v43 }
 0x585   :  { %587 = vmatmul.msk.bf16.vlgmr.msra.gmra.mxu1 %vm129_vm3, %v456_v44 }
 0x586   :  { %v448_v45 = vpop.f32.mrf.mxu0 }
 0x602   :  { %v489_v47 = vpop.f32.mrf.mxu1 }
 0x603   :  { %v490_v48 = vadd.f32 %v619_v46, %v489_v47 }
 0x605   :  { %494 = vst.msk [vmem:[%s874_s20] sm:$0xff] %vm493_vm6, %v490_v48 }
 0x60a   :  { %v491_v49 = vpop.f32.mrf.mxu1 }

</bundles_post_ra>
